<compile_context>
chip_gen: v6e
topology: v6e:2x2x1
jax: 0.10.0
libtpu: 0.0.40
codegen_flags: <defaults>
</compile_context>

<pallas_src>
import functools

import jax
import jax.numpy as jnp
from jax.experimental import pallas as pl
from jax.experimental.pallas import tpu as pltpu


def _matchshifted_kernel(mask_ref, left_ref, right_ref, out_ref, *, shift):
    # mask_ref : (1, HW) int32, 1 where column-within-row >= shift; resident in
    #            VMEM across every grid step (constant index_map).
    # left_ref / right_ref : (1, Cblk, HW) tile.
    # out_ref  : (1, 2, Cblk, HW) tile -> [:,0] shifted_left, [:,1] shifted_right.
    l = left_ref[0]    # (Cblk, HW)
    r = right_ref[0]   # (Cblk, HW)

    if shift == 0:
        out_ref[0, 0] = l.astype(out_ref.dtype)
        out_ref[0, 1] = r.astype(out_ref.dtype)
        return

    keep = mask_ref[...] != 0           # (1, HW) -> broadcasts over Cblk
    zero = jnp.array(0, dtype=l.dtype)

    # shifted_left: zero the first `shift` columns of every image row.
    sl = jnp.where(keep, l, zero)

    # shifted_right: right[..., w - shift] for w >= shift, else 0.
    # Rolling the flattened H*W axis only crosses row boundaries in the first
    # `shift` columns of each row, which the mask zeroes anyway.
    sr = jnp.where(keep, pltpu.roll(r, shift, axis=1), zero)

    out_ref[0, 0] = sl.astype(out_ref.dtype)
    out_ref[0, 1] = sr.astype(out_ref.dtype)


def _choose_cblk(C, hw, itemsize, B, budget_bytes,
                 target_steps=8, min_block_bytes=512 << 10):
    """Pick a channel block size that is (a) within the per-block VMEM budget,
    (b) layout-legal (full C or dtype-aware sublane-aligned), (c) gives enough
    grid steps for the DMA pipeline to overlap, (d) keeps blocks big enough
    that per-step overhead stays negligible."""
    hw_bytes = hw * itemsize
    # dtype-aware sublane alignment: 8 (f32), 16 (bf16), 32 (int8/fp8).
    align = max(8, 32 // max(int(itemsize), 1))

    candidates = sorted({C} | set(range(align, C, align)))
    feasible = [c for c in candidates if c * hw_bytes <= budget_bytes]
    if not feasible:
        # Even one aligned channel group overflows the budget; keep the block
        # layout-legal and let the wrapper's VMEM limit absorb it.
        return min(C, align)

    def steps(c):
        return B * ((C + c - 1) // c)

    # Tier A: enough steps AND big blocks.  Tier B: prioritize pipelining.
    tier = [c for c in feasible
            if steps(c) >= target_steps and c * hw_bytes >= min_block_bytes]
    if not tier:
        tier = [c for c in feasible if steps(c) >= target_steps]
    if not tier:
        tier = feasible

    best = max(tier)
    # Prefer an exact divisor of C (no ragged padded last block) when one is
    # close to the best block size.
    divisors = [c for c in tier if C % c == 0 and 2 * c >= best]
    return max(divisors) if divisors else best


def _vmem_capacity_bytes():
    try:
        info = pltpu.get_tpu_info()
        return int(getattr(info, "vmem_capacity_bytes", 64 << 20))
    except Exception:
        return 64 << 20  # conservative (v7x-sized) fallback


def matchshifted(left, right, shift):
    B, C, H, W = left.shape
    assert right.shape == left.shape and right.dtype == left.dtype
    shift = int(shift)
    assert 0 <= shift <= W, "shift must satisfy 0 <= shift <= width"

    hw = H * W
    itemsize = jnp.dtype(left.dtype).itemsize

    # Generation-aware block budget: bigger blocks on 128 MiB-VMEM parts
    # (v5e/v6e), conservative on v7x (64 MiB per TensorCore).
    vmem_cap = _vmem_capacity_bytes()
    budget_bytes = (4 << 20) if vmem_cap >= (100 << 20) else (2 << 20)

    cblk = _choose_cblk(C, hw, itemsize, B, budget_bytes)
    n_c = (C + cblk - 1) // cblk

    # Free metadata reshapes: present a lane-dense H*W last dimension.
    left2 = left.reshape(B, C, hw)
    right2 = right.reshape(B, C, hw)

    # Per-row keep mask, computed once outside the kernel and resident in VMEM
    # across every grid step (constant index_map) — no per-step VPU mod work.
    col = jnp.arange(hw, dtype=jnp.int32) % jnp.int32(W)
    mask = (col >= jnp.int32(shift)).astype(jnp.int32).reshape(1, hw)

    kernel = functools.partial(_matchshifted_kernel, shift=shift)

    # Pure data movement: 2 reads + 2 writes of B*C*H*W elements, zero flops.
    cost = pl.CostEstimate(
        flops=0,
        transcendentals=0,
        bytes_accessed=4 * B * C * hw * itemsize + hw * 4,
    )

    # ~10x block bytes pipelined (2 inputs + 2-wide output, double-buffered)
    # plus headroom for Mosaic internal scratch.  Never request more than the
    # physical VMEM minus ~16 MiB (v7x has only 64 MiB per core).
    block_bytes = cblk * hw * itemsize
    vmem_needed = 10 * block_bytes + (4 << 20)
    safe_cap = max(16 << 20, vmem_cap - (16 << 20))
    params = dict(dimension_semantics=("parallel", "parallel"))
    if vmem_needed > (16 << 20):
        params["vmem_limit_bytes"] = int(min(vmem_needed, safe_cap))
    compiler_params = pltpu.CompilerParams(**params)

    out4 = pl.pallas_call(
        kernel,
        out_shape=jax.ShapeDtypeStruct((B, 2, C, hw), left.dtype),
        grid=(B, n_c),
        in_specs=[
            pl.BlockSpec((1, hw), lambda b, c: (0, 0)),            # mask (resident)
            pl.BlockSpec((1, cblk, hw), lambda b, c: (b, c, 0)),   # left
            pl.BlockSpec((1, cblk, hw), lambda b, c: (b, c, 0)),   # right
        ],
        out_specs=pl.BlockSpec((1, 2, cblk, hw), lambda b, c: (b, 0, c, 0)),
        compiler_params=compiler_params,
        cost_estimate=cost,
    )(mask, left2, right2)

    # cat((shifted_left, shifted_right), dim=1).view(B, 2C, 1, H, W):
    # (B, 2, C, H*W) -> (B, 2C, 1, H, W) is a pure metadata reshape.
    return out4.reshape(B, 2 * C, 1, H, W)


def matchshifted_ref(left, right, shift):
    # Pure-JAX reference mirroring the PyTorch forward.
    B, C, H, W = left.shape
    sl = jnp.pad(left[:, :, :, shift:], ((0, 0), (0, 0), (0, 0), (shift, 0)))
    sr = jnp.pad(right[:, :, :, : W - shift], ((0, 0), (0, 0), (0, 0), (shift, 0)))
    return jnp.concatenate([sl, sr], axis=1).reshape(B, 2 * C, 1, H, W)


if __name__ == "__main__":
    key = jax.random.PRNGKey(0)
    k1, k2 = jax.random.split(key)
    B, C, H, W = 2, 4, 16, 16
    left = jax.random.normal(k1, (B, C, H, W), dtype=jnp.float32)
    right = jax.random.normal(k2, (B, C, H, W), dtype=jnp.float32)

    for shift in (3, 0, W):
        out = jax.block_until_ready(matchshifted(left, right, shift))
        ref = matchshifted_ref(left, right, shift)
        assert out.shape == (B, 2 * C, 1, H, W), out.shape
        assert out.dtype == left.dtype
        assert jnp.array_equal(out, ref), f"mismatch vs reference at shift={shift}"

    print("KERNEL_OK")
</pallas_src>

<mosaic_0001>
module attributes {stable_mosaic.version = 11 : i64} {
  func.func @_matchshifted_kernel(%arg0: i32, %arg1: i32, %arg2: memref<1x256xi32, #tpu.memory_space<vmem>>, %arg3: memref<1x4x256xf32, #tpu.memory_space<vmem>>, %arg4: memref<1x4x256xf32, #tpu.memory_space<vmem>>, %arg5: memref<1x2x4x256xf32, #tpu.memory_space<vmem>>) attributes {dimension_semantics = [#tpu.dimension_semantics<parallel>, #tpu.dimension_semantics<parallel>], iteration_bounds = array<i64: 2, 1>, scalar_prefetch = 0 : i64, scratch_operands = 0 : i64, tpu.core_type = #tpu.core_type<tc>, window_params = [{pipeline_mode = #tpu.pipeline_mode<synchronous>, transform_indices = @transform_0, window_bounds = array<i64: 1, 256>}, {transform_indices = @transform_1, window_bounds = array<i64: 1, 4, 256>}, {transform_indices = @transform_2, window_bounds = array<i64: 1, 4, 256>}, {transform_indices = @transform_3, window_bounds = array<i64: 1, 2, 4, 256>}]} {
    %c0 = arith.constant 0 : index
    %c0_0 = arith.constant 0 : index
    %c0_1 = arith.constant 0 : index
    %0 = vector.load %arg3[%c0, %c0_0, %c0_1] : memref<1x4x256xf32, #tpu.memory_space<vmem>>, vector<1x4x256xf32>
    %1 = vector.shape_cast %0 : vector<1x4x256xf32> to vector<4x256xf32>
    %c0_2 = arith.constant 0 : index
    %c0_3 = arith.constant 0 : index
    %c0_4 = arith.constant 0 : index
    %2 = vector.load %arg4[%c0_2, %c0_3, %c0_4] : memref<1x4x256xf32, #tpu.memory_space<vmem>>, vector<1x4x256xf32>
    %3 = vector.shape_cast %2 : vector<1x4x256xf32> to vector<4x256xf32>
    %c0_5 = arith.constant 0 : index
    %c0_6 = arith.constant 0 : index
    %4 = vector.load %arg2[%c0_5, %c0_6] : memref<1x256xi32, #tpu.memory_space<vmem>>, vector<1x256xi32>
    %c0_i32 = arith.constant 0 : i32
    %5 = vector.broadcast %c0_i32 : i32 to vector<1x256xi32>
    %6 = arith.cmpi ne, %4, %5 : vector<1x256xi32>
    %cst = arith.constant 0.000000e+00 : f32
    %7 = vector.shape_cast %6 : vector<1x256xi1> to vector<1x256xi1>
    %8 = vector.broadcast %7 : vector<1x256xi1> to vector<4x256xi1>
    %9 = vector.broadcast %cst : f32 to vector<4x256xf32>
    %10 = arith.select %8, %1, %9 : vector<4x256xi1>, vector<4x256xf32>
    %c3_i32 = arith.constant 3 : i32
    %11 = tpu.dynamic_rotate %3 by %c3_i32 dim 1 : vector<4x256xf32>, i32 -> vector<4x256xf32>
    %cst_7 = arith.constant 0.000000e+00 : f32
    %12 = vector.shape_cast %6 : vector<1x256xi1> to vector<1x256xi1>
    %13 = vector.broadcast %12 : vector<1x256xi1> to vector<4x256xi1>
    %14 = vector.broadcast %cst_7 : f32 to vector<4x256xf32>
    %15 = arith.select %13, %11, %14 : vector<4x256xi1>, vector<4x256xf32>
    %c0_8 = arith.constant 0 : index
    %c0_9 = arith.constant 0 : index
    %c0_10 = arith.constant 0 : index
    %c0_11 = arith.constant 0 : index
    %16 = vector.load %arg5[%c0_8, %c0_9, %c0_10, %c0_11] : memref<1x2x4x256xf32, #tpu.memory_space<vmem>>, vector<1x1x4x256xf32>
    %17 = vector.shape_cast %16 : vector<1x1x4x256xf32> to vector<4x256xf32>
    %18 = vector.shape_cast %10 : vector<4x256xf32> to vector<1x1x4x256xf32>
    tpu.vector_store %arg5[%c0_8, %c0_9, %c0_10, %c0_11], %18 {strides = array<i32>} : memref<1x2x4x256xf32, #tpu.memory_space<vmem>>, vector<1x1x4x256xf32>,
    %c0_12 = arith.constant 0 : index
    %c1 = arith.constant 1 : index
    %c0_13 = arith.constant 0 : index
    %c0_14 = arith.constant 0 : index
    %19 = vector.load %arg5[%c0_12, %c1, %c0_13, %c0_14] : memref<1x2x4x256xf32, #tpu.memory_space<vmem>>, vector<1x1x4x256xf32>
    %20 = vector.shape_cast %19 : vector<1x1x4x256xf32> to vector<4x256xf32>
    %21 = vector.shape_cast %15 : vector<4x256xf32> to vector<1x1x4x256xf32>
    tpu.vector_store %arg5[%c0_12, %c1, %c0_13, %c0_14], %21 {strides = array<i32>} : memref<1x2x4x256xf32, #tpu.memory_space<vmem>>, vector<1x1x4x256xf32>,
    return
  }
  func.func @transform_0(%arg0: i32, %arg1: i32) -> (i32, i32) {
    %c0_i32 = arith.constant 0 : i32
    %c0_i32_0 = arith.constant 0 : i32
    %c0_i32_1 = arith.constant 0 : i32
    return %c0_i32, %c0_i32_0 : i32, i32
  }
  func.func @transform_1(%arg0: i32, %arg1: i32) -> (i32, i32, i32) {
    %c0_i32 = arith.constant 0 : i32
    %c0_i32_0 = arith.constant 0 : i32
    return %arg0, %arg1, %c0_i32 : i32, i32, i32
  }
  func.func @transform_2(%arg0: i32, %arg1: i32) -> (i32, i32, i32) {
    %c0_i32 = arith.constant 0 : i32
    %c0_i32_0 = arith.constant 0 : i32
    return %arg0, %arg1, %c0_i32 : i32, i32, i32
  }
  func.func @transform_3(%arg0: i32, %arg1: i32) -> (i32, i32, i32, i32) {
    %c0_i32 = arith.constant 0 : i32
    %c0_i32_0 = arith.constant 0 : i32
    %c0_i32_1 = arith.constant 0 : i32
    return %arg0, %c0_i32, %arg1, %c0_i32_0 : i32, i32, i32, i32
  }
}

</mosaic_0001>

<bundles_post_ra>
// kernel: tpu_custom_call.1
= control target key start
LH: loop header
LB: loop body
LE: loop exit
PB: predicated region body
PF: predicated region fallthrough
CT: control target
= control target key end

     0   :  { %8 = vsyncpa [#allocation3], 0  ;;  %s944_s0 = inlined_call_operand.hbm [shape: s32[1,256], index: 0, kind: input, shape index: {}]   ;;  %s945_s1 = inlined_call_operand.hbm [shape: f32[2,4,256], index: 1, kind: input, shape index: {}]   ;;  %s946_s2 = inlined_call_operand.hbm [shape: f32[2,4,256], index: 2, kind: input, shape index: {}]   ;;  %s947_s3 = inlined_call_operand.hbm [shape: f32[2,2,4,256], index: 3, kind: output, shape index: {}]  }
   0x1   :  { %9 = vsyncpa [#allocation6], 0 }
   0x2   :  { %11 = vsyncpa [#allocation6 + $0x1], 0 }
   0x3   :  { %12 = vsyncpa [#allocation4], 0 }
   0x4   :  { %14 = vsyncpa [#allocation4 + $0x1], 0  ;;  %s745_s12 = smov 0   ;;  %s747_s13 = smov 0  }
   0x5   :  { %s749_s14 = smov 0   ;;  %s751_s15 = smov 0  }
   0x6   :  { %s753_s16 = smov 0   ;;  %s755_s17 = smov 0  }
   0x7 LB: > { %s32_s18 = sadd.s32 1, %s711_s16  ;;  %s62_s19 = sadd.s32 1, %s703_s14  ;;  %s715_s17 = sphi %s755_s17, %s20_s17   ;;  %s711_s16 = sphi %s753_s16, %s968_s16   ;;  %s707_s15 = sphi %s751_s15, %s967_s15   ;;  %s703_s14 = sphi %s749_s14, %s966_s14   ;;  %s699_s13 = sphi %s747_s13, %s965_s13   ;;  %s695_s12 = sphi %s745_s12, %s964_s12  }
   0x8   : > { %p34_p0 = scmp.ge.s32.totalorder %s32_s18, 2  ;;  %p69_p1 = scmp.ne.s32.totalorder %s703_s14, %s699_s13 }
   0x9   : > { %p70_p2 = scmp.eq.s32.totalorder %s715_s17, 0  ;;  %p491_p5 = scmp.lt.s32.totalorder %s715_s17, 2 }
   0xa   : > { %s970_s18 = smov (%p34_p0, %s32_s18), 0  ;;  %s166_s21 = sand.u32 1, %s715_s17  }
   0xb   : > { %p71_p4 = por %p70_p2, %p69_p1  ;;  %s57_s20 = ssub.s32 %s711_s16, %s970_s18 }
   0xc   : > { %p60_p6 = scmp.eq.s32.totalorder %s57_s20, 0  ;;  %s168_s22 = sand.u32 1, %s703_s14  }
   0xd   : > { %s462_s23 = sshll.u32 %s711_s16, 7  ;;  %s795_s25 = sshll.u32 %s168_s22, 3 }
   0xe   : > { %s793_s24 = scalar_select %p60_p6, %s703_s14, %s62_s19  }
   0xf   : > { %s178_s28 = scalar_lea.hbm %s945_s1, %s462_s23  ;;  %p802_p7 = pnand %p491_p5, %p71_p4 }
  0x10   : > { %s170_s30 = scalar_lea.vmem [#allocation5], %s795_s25  ;;  %s807_s5 = scalar_lea.sflag [#allocation6], %s166_s21 }
  0x11   : > { %s180_s4 = sshll.u32 %s170_s30, 4  ;;  %p551_p8 = pneg %p802_p7  ;;  %s181_s4 = int_to_ptr.vmem [resolvable:$true] %s180_s4 }
  0x12   : > { %s562_s6 = scalar_lea.vmem %s181_s4, 128  ;;  %s717_s7 = smov [#allocation5]  }
  0x13   : > { %p563_p9 = scmp.ne.s32.totalorder %s181_s4, %s562_s6  ;;  %s567_s8 = sshll.u32 %s717_s7, 4  ;;  %s568_s8 = int_to_ptr.vmem [resolvable:$false] %s567_s8 }
  0x14   : > { %s569_s9 = scalar_lea.vmem %s568_s8, 256  ;;  %p570_p12 = scmp.lt.s32.totalorder %s181_s4, %s568_s8 }
  0x15   : > { %p565_p10 = pnand %p563_p9, %p551_p8  ;;  %p571_p13 = scmp.lt.s32.totalorder %s569_s9, %s562_s6 }
  0x17   : > { %p566_p11 = pneg %p565_p10  ;;  %p572_p0 = por %p571_p13, %p570_p12 }
  0x19   : > { %p573_p2 = pnand %p572_p0, %p566_p11 }
  0x1b   : > { %576 = shalt.err (!%p573_p2)
}
  0x1c   : > { %482 = dma.hbm_to_vmem [thread:$0]  (!%p802_p7), %s178_s28, 128, %s181_s4, %s807_s5  }
  0x1d   : > { %s818_s10 = sadd.s32 4294967295, %s715_s17   ;;  %s441_s11 = sadd.s32 4294967294, %s715_s17  }
  0x1e   : > { %p75_p4 = scmp.ne.s32.totalorder %s699_s13, %s695_s12  ;;  %p948_p5 = scmp.eq.s32.totalorder %s818_s10, 0 }
  0x1f   : > { %p129_p6 = scmp.eq.s32.totalorder %s818_s10, 1  ;;  %p135_p9 = scmp.eq.s32.totalorder %s441_s11, 1 }
  0x20   : > { %p442_p10 = scmp.ge.s32.totalorder %s715_s17, 1  ;;  %p828_p11 = por %p948_p5, %p75_p4 }
  0x21   : > { %p835_p12 = por %p129_p6, %p69_p1  ;;  %p839_p13 = por %p135_p9, %p75_p4 }
  0x22   : > { %s952_s19 = scalar_select %p828_p11, 1, 0 }
  0x23   : > { %s953_s20 = scalar_select %p835_p12, 1, 0 }
  0x24   : > { %s954_s21 = scalar_select %p839_p13, 1, 0 }
  0x25   : > { %p142_p0 = scmp.lt.s32.totalorder %s715_s17, 3  ;;  %s199_s27 = scalar_lea.hbm %s946_s2, %s462_s23 }
  0x26   : > { %s718_s30 = smov [#allocation2]   ;;  %s191_s6 = scalar_lea.vmem [#allocation7], %s795_s25 }
  0x27   : > { %p849_p2 = pnand %p442_p10, %p142_p0  ;;  %s155_s4 = sshll.u32 %s718_s30, 4  ;;  %s156_s4 = int_to_ptr.vmem [resolvable:$true] %s155_s4 }
  0x28   : > { %s201_s7 = sshll.u32 %s191_s6, 4  ;;  %s719_s9 = smov [#allocation7]   ;;  %s202_s7 = int_to_ptr.vmem [resolvable:$true] %s201_s7 }
  0x29   : > { %s590_s8 = scalar_lea.vmem %s202_s7, 128  ;;  %s595_s23 = sshll.u32 %s719_s9, 4  ;;  %s596_s23 = int_to_ptr.vmem [resolvable:$false] %s595_s23 }
  0x2a   : > { %p591_p4 = scmp.ne.s32.totalorder %s202_s7, %s590_s8  ;;  %s597_s11 = scalar_lea.vmem %s596_s23, 256 }
  0x2b   : > { %p598_p10 = scmp.lt.s32.totalorder %s202_s7, %s596_s23  ;;  %p599_p0 = scmp.lt.s32.totalorder %s597_s11, %s590_s8 }
  0x2c   : > { %p593_p6 = pnand %p591_p4, %p551_p8 }
  0x2d   : > { %p600_p3 = por %p599_p0, %p598_p10 }
  0x2e   : > { %p594_p9 = pneg %p593_p6 }
  0x30   : > { %p601_p5 = pnand %p600_p3, %p594_p9 }
  0x32   : > { %604 = shalt.err (!%p601_p5)
}
  0x33   : > { %485 = dma.hbm_to_vmem [thread:$0]  (!%p802_p7), %s199_s27, 128, %s202_s7, %s807_s5  }
  0x34   : > { %p956_p1 = scmp.eq.s32.totalorder %s818_s10, 0  ;;  %p957_p8 = pneg %p849_p2 }
  0x35   : > { %s616_s25 = scalar_lea.vmem %s156_s4, 32  ;;  %p624_p0 = scmp.lt.s32.totalorder %s156_s4, %s156_s4 }
  0x36   : > { %p476_p4 = pnand %p957_p8, %p956_p1  ;;  %p617_p13 = scmp.ne.s32.totalorder %s156_s4, %s616_s25 }
  0x37   : > { %p625_p10 = scmp.lt.s32.totalorder %s616_s25, %s616_s25 }
  0x38   : > { %p607_p6 = pneg %p476_p4 }
  0x39   : > { %p626_p3 = por %p625_p10, %p624_p0 }
  0x3a   : > { %p619_p12 = pnand %p617_p13, %p607_p6 }
  0x3c   : > { %p620_p11 = pneg %p619_p12 }
  0x3e   : > { %p627_p5 = pnand %p626_p3, %p620_p11 }
  0x40   : > { %630 = shalt.err (!%p627_p5)
}
  0x41   : > { %478 = dma.hbm_to_vmem [thread:$0]  (!%p476_p4), %s944_s0, 32, %s156_s4, [#allocation3]  }
  0x42   : > { %210 = sbr.rel (%p849_p2) target bundleno = 216 (0xd8), region = 32  ;;  %p958_p7 = scmp.eq.s32.totalorder (!%p849_p2), %s818_s10, 0 }
  0x47   : > { %682 = dma.done.wait (%p958_p7), [#allocation3], 32   ;;  %p959_p1 = pmov %p958_p7 }
  0x48   : > { %s216_s5 = sand.u32 1, %s818_s10   ;;  %s878_s26 = sand.u32 1, %s699_s13  }
  0x49   : > { %684 = vsyncadd (%p959_p1), [#allocation3], 4294967264  ;;  %s453_s27 = sshll.u32 %s878_s26, 3  ;;  %s217_s30 = scalar_lea.sflag [#allocation6], %s216_s5 }
  0x4a   : > { %s220_s6 = scalar_lea.vmem [#allocation5], %s453_s27  ;;  %p960_p11 = scmp.ne.s32.totalorder %s952_s19, 0 }
  0x4c   : > { %686 = dma.done.wait (%p960_p11), %s217_s30, 256  }
  0x4d   : > { %688 = vsyncadd (%p960_p11), %s217_s30, 4294967040  ;;  %v262_v0 = vlaneseq  ;;  %s229_s28 = scalar_lea.vmem [#allocation7], %s453_s27  ;;  %v259_v5 = vld [vmem:[#allocation2] sm:$0x3]  ;;  %v257_v6 = vld [vmem:[%s220_s6] sm:$0xff]  ;;  %s720_s10 = smov 3  }
  0x4e   : > { %v258_v4 = vld [vmem:[%s229_s28] sm:$0xff]  ;;  %vm260_vm0 = vcmp.ne.s32.totalorder %v259_v5, 0  ;;  %v721_v8 = vmov 0   ;;  %v273_v10 = vcombine.high %v257_v6, %v257_v6  ;;  %s455_s4 = sshll.u32 %s878_s26, 4  ;;  %s464_s8 = sshll.u32 %s707_s15, 8 }
  0x4f   : > { %v263_v1 = vshrl.u32 %v262_v0, 7  ;;  %280 = vrot.lane.b32.xlu0 %v258_v4, %s720_s10  ;;  %v278_v7 = vcombine.high %v258_v4, %v258_v4  ;;  %v261_v9 = vsel %vm260_vm0, 1, %v721_v8  ;;  %s256_s19 = scalar_lea.vmem [#allocation8], %s455_s4  ;;  %v285_v16 = vand.u32 127, %v262_v0  ;;  %s896_s11 = scalar_lea.hbm %s947_s3, %s464_s8 }
  0x50   : > { %s318_s7 = sshll.u32 %s256_s19, 4  ;;  %s303_s15 = scalar_lea.sflag [#allocation4], %s878_s26  ;;  %s889_s7 = int_to_ptr.vmem [resolvable:$true] %s318_s7 }
  0x51   : > { %v264_v2 = vsub.s32 0, %v263_v1  ;;  %v268_v3 = vsub.s32 1, %v263_v1  ;;  %vm286_vm3 = vcmp.lt.s32.totalorder %v285_v16, 3  ;;  %s631_s25 = scalar_lea.vmem %s889_s7, 256  ;;  %p961_p13 = scmp.ne.s32.totalorder %s953_s20, 0 }
  0x52   : > { %p632_p12 = scmp.ne.s32.totalorder %s889_s7, %s631_s25  ;;  %s722_s29 = smov [#allocation8]  }
  0x53   : > { %v265_v11 = vrot.slane %v261_v9, %v264_v2  ;;  %v269_v12 = vrot.slane %v261_v9, %v268_v3  ;;  %282 = vrot.lane.b32.xlu0 %v278_v7, %s720_s10  ;;  %s635_s22 = sshll.u32 %s722_s29, 4  ;;  %s636_s22 = int_to_ptr.vmem [resolvable:$false] %s635_s22 }
  0x54   : > { %p633_p2 = pnand %p632_p12, %p961_p13  ;;  %s637_s5 = scalar_lea.vmem %s636_s22, 512 }
  0x55   : > { %vm270_vm1 = vcmp.eq.s32.totalorder %v265_v11, 1  ;;  %vm271_vm2 = vcmp.eq.s32.totalorder %v269_v12, 1  ;;  %p638_p8 = scmp.lt.s32.totalorder %s889_s7, %s636_s22  ;;  %p639_p4 = scmp.lt.s32.totalorder %s637_s5, %s631_s25 }
  0x56   : > { %v275_v13 = vsel %vm270_vm1, %v257_v6, 0.0  ;;  %v276_v14 = vsel %vm271_vm2, %v273_v10, 0.0  ;;  %p634_p9 = pneg %p633_p2 }
  0x57   : > { %v293_v15 = vcombine.low %v275_v13, %v276_v14  ;;  %p640_p6 = por %p639_p4, %p638_p8 }
  0x59   : > { %295 = vst [vmem:[%s256_s19] sm:$0xff] %v293_v15  ;;  %p641_p0 = pnand %p640_p6, %p634_p9 }
  0xc1   : > { %v281_v17 = vpop.permute.xlu0 %280 }
  0xc5   : > { %v283_v18 = vpop.permute.xlu0 %282 }
  0xc6   : > { %v287_v19 = vsel %vm286_vm3, %v281_v17, %v283_v18  ;;  %v288_v20 = vsel %vm286_vm3, %v283_v18, %v281_v17 }
  0xc7   : > { %v289_v21 = vsel %vm270_vm1, %v288_v20, 0.0  ;;  %v290_v22 = vsel %vm271_vm2, %v287_v19, 0.0 }
  0xc8   : > { %v298_v23 = vcombine.low %v289_v21, %v290_v22 }
  0xca   : > { %456 = vst [vmem:[%s256_s19 + $0x8] sm:$0xff] %v298_v23 }
  0xcb   : > { %644 = shalt.err (!%p641_p0)
}
  0xcc   : > { %s645_s27 = scalar_lea.hbm %s896_s11, 256  ;;  %s649_s28 = scalar_lea.hbm %s947_s3, 512 }
  0xcd   : > { %p646_p10 = scmp.ne.s32.totalorder %s896_s11, %s645_s27  ;;  %p650_p7 = scmp.lt.s32.totalorder %s896_s11, %s947_s3 }
  0xce   : > { %p651_p1 = scmp.lt.s32.totalorder %s649_s28, %s645_s27 }
  0xcf   : > { %p647_p3 = pnand %p646_p10, %p961_p13 }
  0xd0   : > { %p652_p11 = por %p651_p1, %p650_p7 }
  0xd1   : > { %p648_p5 = pneg %p647_p3 }
  0xd3   : > { %p653_p12 = pnand %p652_p11, %p648_p5 }
  0xd5   : > { %656 = shalt.err (!%p653_p12)
}
  0xd6   : > { %s723_s19 = smov 128   ;;  %s724_s8 = smov 8  }
  0xd7   : > { %473 = dma.vmem_to_hbm [thread:$0]  (%p961_p13), %s889_s7, 256, %s896_s11, %s303_s15, %s723_s19, %s723_s19, %s724_s8  }
  0xd8 PF: > { %s333_s9 = sand.u32 1, %s695_s12   ;;  %p962_p2 = scmp.ne.s32.totalorder %s954_s21, 0 }
  0xd9   : > { %p963_p9 = scmp.ge.s32.totalorder %s715_s17, 2  ;;  %s334_s23 = scalar_lea.sflag [#allocation4], %s333_s9 }
  0xdb   : > { %p487_p8 = pnand %p963_p9, %p962_p2 }
  0xdd   : > { %p488_p4 = pneg %p487_p8 }
  0xdf   : > { %690 = dma.done.wait (%p488_p4), %s334_s23, 256  }
  0xe0   : > { %692 = vsyncadd (%p488_p4), %s334_s23, 4294967040  ;;  %s20_s17 = sadd.s32 1, %s715_s17   ;;  %s964_s12 = smov %s699_s13 }
  0xe1   : > { %p17_p6 = scmp.ge.s32.totalorder %s20_s17, 4   ;;  %s965_s13 = smov %s703_s14 }
  0xe2   : > { %s966_s14 = smov %s793_s24  ;;  %s967_s15 = smov %s711_s16 }
  0xe3   : > { %s968_s16 = smov %s970_s18  ;;  %19 = sbr.rel (!%p17_p6) target bundleno = 7 (0x7), region = 94 }
  0xe8   :  { %339 = vsyncpa [#allocation3], 1 }
  0xe9   :  { %341 = vsyncpa [#allocation3 + $0x1], 1 }
  0xea   :  { %342 = vsyncpa [#allocation6], 1 }
  0xeb   :  { %344 = vsyncpa [#allocation6 + $0x1], 1 }
  0xec   :  { %345 = vsyncpa [#allocation4], 1 }
  0xed   :  { %347 = vsyncpa [#allocation4 + $0x1], 1 }

</bundles_post_ra>
